<compile_context>
chip_gen: v7x
topology: tpu7x:2x2x1
jax: 0.10.0
libtpu: 0.0.40
codegen_flags: <defaults>
</compile_context>

<pallas_src>
import functools

import jax
import jax.numpy as jnp
from jax.experimental import pallas as pl
from jax.experimental.pallas import tpu as pltpu


# ----------------------------------------------------------------------------- #
# Pallas kernels
# ----------------------------------------------------------------------------- #
def _conv1x1_kernel(x_ref, w_ref, b_ref, o_ref):
    # x_ref: (1, C_in, TP)   w_ref: (classes, C_in)   b_ref: (classes, 1)
    # o_ref: (1, classes, TP)
    acc = jnp.dot(w_ref[...], x_ref[0], preferred_element_type=jnp.float32)  # (classes, TP)
    o_ref[0] = (acc + b_ref[...]).astype(o_ref.dtype)


def _bilinear_kernel(a_ref, x_ref, bt_ref, o_ref):
    # a_ref : (TH, H_in)        x_ref : (1, H_in, W_in)
    # bt_ref: (W_in, W_out)     o_ref : (1, TH, W_out)
    tmp = jnp.dot(a_ref[...], x_ref[0], preferred_element_type=jnp.float32)    # (TH, W_in)
    out = jnp.dot(tmp, bt_ref[...], preferred_element_type=jnp.float32)        # (TH, W_out)
    o_ref[0] = out.astype(o_ref.dtype)


# ----------------------------------------------------------------------------- #
# Tiling helpers
# ----------------------------------------------------------------------------- #
def _choose_tile(total, max_tile, align):
    """Largest tile <= max_tile that satisfies the (8,128) layout rule.

    Returns the full dim if it already fits, else a multiple of `align`
    (uneven division is handled by Pallas output masking).
    """
    if total <= max_tile:
        return total
    return max((max_tile // align) * align, align)


# ----------------------------------------------------------------------------- #
# Wrappers
# ----------------------------------------------------------------------------- #
def conv1x1(x_nchw, weight, bias, *, max_spatial_tile=2048):
    """1x1 conv, stride 1, no pad, in native NCHW.

    x: (N, C_in, H, W), weight: (classes, C_in), bias: (classes,).
    """
    n, c_in, h, w = x_nchw.shape
    classes = weight.shape[0]
    hw = h * w

    x3 = x_nchw.reshape(n, c_in, hw)          # free reshape (contiguous)
    b2d = bias.reshape(classes, 1)

    tp = _choose_tile(hw, max_spatial_tile, 128)      # lane-dim tile (multiple of 128 or full)
    grid = (n, pl.cdiv(hw, tp))

    out3 = pl.pallas_call(
        _conv1x1_kernel,
        out_shape=jax.ShapeDtypeStruct((n, classes, hw), x_nchw.dtype),
        grid_spec=pl.GridSpec(
            grid=grid,
            in_specs=[
                pl.BlockSpec((1, c_in, tp), lambda i, p: (i, 0, p)),
                pl.BlockSpec((classes, c_in), lambda i, p: (0, 0)),
                pl.BlockSpec((classes, 1), lambda i, p: (0, 0)),
            ],
            out_specs=pl.BlockSpec((1, classes, tp), lambda i, p: (i, 0, p)),
        ),
        compiler_params=pltpu.CompilerParams(
            dimension_semantics=("parallel", "parallel")),
    )(x3, weight, b2d)

    return out3.reshape(n, classes, h, w)     # free reshape


def _bilinear_matrix(out_size, in_size, dtype=jnp.float32):
    """Row-interpolation matrix matching PyTorch bilinear, align_corners=False."""
    scale = in_size / out_size
    dst = jnp.arange(out_size, dtype=jnp.float32)
    src = (dst + 0.5) * scale - 0.5
    src = jnp.maximum(src, 0.0)                      # PyTorch clamps negative source coords
    i0 = jnp.floor(src).astype(jnp.int32)
    i0 = jnp.minimum(i0, in_size - 1)
    lam = src - i0.astype(jnp.float32)
    i1 = jnp.minimum(i0 + 1, in_size - 1)
    oh0 = jax.nn.one_hot(i0, in_size, dtype=jnp.float32)
    oh1 = jax.nn.one_hot(i1, in_size, dtype=jnp.float32)
    m = oh0 * (1.0 - lam)[:, None] + oh1 * lam[:, None]
    return m.astype(dtype)


def bilinear_upsample(x_nchw, out_h, out_w, *, max_row_tile=256):
    """Bilinear (align_corners=False) upsample of NCHW tensor to (out_h, out_w)."""
    n, c, h_in, w_in = x_nchw.shape
    a = _bilinear_matrix(out_h, h_in, x_nchw.dtype)                  # (H_out, H_in)
    bt = jnp.transpose(_bilinear_matrix(out_w, w_in, x_nchw.dtype))  # (W_in, W_out)

    x3 = x_nchw.reshape(n * c, h_in, w_in)                           # free reshape

    th = _choose_tile(out_h, max_row_tile, 8)        # sublane-dim tile (multiple of 8 or full)
    grid = (n * c, pl.cdiv(out_h, th))

    out3 = pl.pallas_call(
        _bilinear_kernel,
        out_shape=jax.ShapeDtypeStruct((n * c, out_h, out_w), x_nchw.dtype),
        grid_spec=pl.GridSpec(
            grid=grid,
            in_specs=[
                pl.BlockSpec((th, h_in), lambda i, hb: (hb, 0)),
                pl.BlockSpec((1, h_in, w_in), lambda i, hb: (i, 0, 0)),
                pl.BlockSpec((w_in, out_w), lambda i, hb: (0, 0)),
            ],
            out_specs=pl.BlockSpec((1, th, out_w), lambda i, hb: (i, hb, 0)),
        ),
        compiler_params=pltpu.CompilerParams(
            dimension_semantics=("parallel", "parallel")),
    )(a, x3, bt)

    return out3.reshape(n, c, out_h, out_w)


def seg_detector_forward(x, img, weight, bias, training=False):
    """x: (N, inner_channels, H, W); img: (N, 3, H_img, W_img)."""
    y = conv1x1(x, weight, bias)                       # (N, classes, H, W)
    y = bilinear_upsample(y, img.shape[2], img.shape[3])
    if training:
        return {
            "pre_text": y[:, 0],
            "pre_kernel": y[:, 1],
            "similarity_vector": y[:, 2:],
        }
    return y


# ----------------------------------------------------------------------------- #
# Demo
# ----------------------------------------------------------------------------- #
def init_params(key, inner_channels, classes):
    kw, kb = jax.random.split(key)
    weight = jax.random.normal(kw, (classes, inner_channels), jnp.float32) * 0.05
    bias = jax.random.normal(kb, (classes,), jnp.float32) * 0.01
    return weight, bias


if __name__ == "__main__":
    inner_channels = 16
    classes = 6
    n, h, w = 2, 8, 8
    img_h, img_w = 16, 16

    key = jax.random.PRNGKey(0)
    kx, kimg, kp = jax.random.split(key, 3)
    x = jax.random.normal(kx, (n, inner_channels, h, w), jnp.float32)
    img = jax.random.normal(kimg, (n, 3, img_h, img_w), jnp.float32)
    weight, bias = init_params(kp, inner_channels, classes)

    fwd = jax.jit(functools.partial(seg_detector_forward, training=False))
    out = fwd(x, img, weight, bias)
    out = jax.block_until_ready(out)
    assert out.shape == (n, classes, img_h, img_w), out.shape

    # self-check against a pure-JAX reference of the same math
    conv_ref = jnp.einsum("nchw,oc->nohw", x, weight) + bias[None, :, None, None]
    a = _bilinear_matrix(img_h, h)
    b = _bilinear_matrix(img_w, w)
    ref = jnp.einsum("Hh,nchw,Ww->ncHW", a, conv_ref, b)
    assert jnp.allclose(out, ref, atol=1e-4, rtol=1e-4)

    # training-mode path (dict outputs)
    fwd_train = jax.jit(functools.partial(seg_detector_forward, training=True))
    tr = jax.block_until_ready(fwd_train(x, img, weight, bias))
    assert tr["pre_text"].shape == (n, img_h, img_w)
    assert tr["pre_kernel"].shape == (n, img_h, img_w)
    assert tr["similarity_vector"].shape == (n, classes - 2, img_h, img_w)
    assert jnp.allclose(tr["pre_text"], ref[:, 0], atol=1e-4, rtol=1e-4)

    print("KERNEL_OK")
</pallas_src>

<mosaic_0001>
module attributes {stable_mosaic.version = 11 : i64} {
  func.func @_conv1x1_kernel(%arg0: i32, %arg1: i32, %arg2: memref<1x16x64xf32, #tpu.memory_space<vmem>>, %arg3: memref<6x16xf32, #tpu.memory_space<vmem>>, %arg4: memref<6x1xf32, #tpu.memory_space<vmem>>, %arg5: memref<1x6x64xf32, #tpu.memory_space<vmem>>) attributes {dimension_semantics = [#tpu.dimension_semantics<parallel>, #tpu.dimension_semantics<parallel>], iteration_bounds = array<i64: 2, 1>, scalar_prefetch = 0 : i64, scratch_operands = 0 : i64, tpu.core_type = #tpu.core_type<tc>, window_params = [{transform_indices = @transform_0, window_bounds = array<i64: 1, 16, 64>}, {pipeline_mode = #tpu.pipeline_mode<synchronous>, transform_indices = @transform_1, window_bounds = array<i64: 6, 16>}, {pipeline_mode = #tpu.pipeline_mode<synchronous>, transform_indices = @transform_2, window_bounds = array<i64: 6, 1>}, {transform_indices = @transform_3, window_bounds = array<i64: 1, 6, 64>}]} {
    %c0 = arith.constant 0 : index
    %c0_0 = arith.constant 0 : index
    %0 = vector.load %arg3[%c0, %c0_0] : memref<6x16xf32, #tpu.memory_space<vmem>>, vector<6x16xf32>
    %c0_1 = arith.constant 0 : index
    %c0_2 = arith.constant 0 : index
    %c0_3 = arith.constant 0 : index
    %1 = vector.load %arg2[%c0_1, %c0_2, %c0_3] : memref<1x16x64xf32, #tpu.memory_space<vmem>>, vector<1x16x64xf32>
    %2 = vector.shape_cast %1 : vector<1x16x64xf32> to vector<16x64xf32>
    %cst = arith.constant dense<0.000000e+00> : vector<6x64xf32>
    %3 = tpu.matmul %0, %2, %cst {dimension_numbers = #tpu.dot_dimension_numbers<[1], [0], [0], [1], [0, 0, 1, 1], [], []>} : vector<6x16xf32>, vector<16x64xf32>, vector<6x64xf32> -> vector<6x64xf32>
    %c0_4 = arith.constant 0 : index
    %c0_5 = arith.constant 0 : index
    %4 = vector.load %arg4[%c0_4, %c0_5] : memref<6x1xf32, #tpu.memory_space<vmem>>, vector<6x1xf32>
    %5 = vector.broadcast %4 : vector<6x1xf32> to vector<6x64xf32>
    %6 = arith.addf %3, %5 : vector<6x64xf32>
    %c0_6 = arith.constant 0 : index
    %c0_7 = arith.constant 0 : index
    %c0_8 = arith.constant 0 : index
    %7 = vector.load %arg5[%c0_6, %c0_7, %c0_8] : memref<1x6x64xf32, #tpu.memory_space<vmem>>, vector<1x6x64xf32>
    %8 = vector.shape_cast %7 : vector<1x6x64xf32> to vector<6x64xf32>
    %9 = vector.shape_cast %6 : vector<6x64xf32> to vector<1x6x64xf32>
    tpu.vector_store %arg5[%c0_6, %c0_7, %c0_8], %9 {strides = array<i32>} : memref<1x6x64xf32, #tpu.memory_space<vmem>>, vector<1x6x64xf32>,
    return
  }
  func.func @transform_0(%arg0: i32, %arg1: i32) -> (i32, i32, i32) {
    %c0_i32 = arith.constant 0 : i32
    %c0_i32_0 = arith.constant 0 : i32
    return %arg0, %c0_i32, %arg1 : i32, i32, i32
  }
  func.func @transform_1(%arg0: i32, %arg1: i32) -> (i32, i32) {
    %c0_i32 = arith.constant 0 : i32
    %c0_i32_0 = arith.constant 0 : i32
    %c0_i32_1 = arith.constant 0 : i32
    return %c0_i32, %c0_i32_0 : i32, i32
  }
  func.func @transform_2(%arg0: i32, %arg1: i32) -> (i32, i32) {
    %c0_i32 = arith.constant 0 : i32
    %c0_i32_0 = arith.constant 0 : i32
    %c0_i32_1 = arith.constant 0 : i32
    return %c0_i32, %c0_i32_0 : i32, i32
  }
  func.func @transform_3(%arg0: i32, %arg1: i32) -> (i32, i32, i32) {
    %c0_i32 = arith.constant 0 : i32
    %c0_i32_0 = arith.constant 0 : i32
    return %arg0, %c0_i32, %arg1 : i32, i32, i32
  }
}

module attributes {stable_mosaic.version = 11 : i64} {
  func.func @_bilinear_kernel(%arg0: i32, %arg1: i32, %arg2: memref<16x8xf32, #tpu.memory_space<vmem>>, %arg3: memref<1x8x8xf32, #tpu.memory_space<vmem>>, %arg4: memref<8x16xf32, #tpu.memory_space<vmem>>, %arg5: memref<1x16x16xf32, #tpu.memory_space<vmem>>) attributes {dimension_semantics = [#tpu.dimension_semantics<parallel>, #tpu.dimension_semantics<parallel>], iteration_bounds = array<i64: 12, 1>, scalar_prefetch = 0 : i64, scratch_operands = 0 : i64, tpu.core_type = #tpu.core_type<tc>, window_params = [{transform_indices = @transform_0, window_bounds = array<i64: 16, 8>}, {transform_indices = @transform_1, window_bounds = array<i64: 1, 8, 8>}, {pipeline_mode = #tpu.pipeline_mode<synchronous>, transform_indices = @transform_2, window_bounds = array<i64: 8, 16>}, {transform_indices = @transform_3, window_bounds = array<i64: 1, 16, 16>}]} {
    %c0 = arith.constant 0 : index
    %c0_0 = arith.constant 0 : index
    %0 = vector.load %arg2[%c0, %c0_0] : memref<16x8xf32, #tpu.memory_space<vmem>>, vector<16x8xf32>
    %c0_1 = arith.constant 0 : index
    %c0_2 = arith.constant 0 : index
    %c0_3 = arith.constant 0 : index
    %1 = vector.load %arg3[%c0_1, %c0_2, %c0_3] : memref<1x8x8xf32, #tpu.memory_space<vmem>>, vector<1x8x8xf32>
    %2 = vector.shape_cast %1 : vector<1x8x8xf32> to vector<8x8xf32>
    %cst = arith.constant dense<0.000000e+00> : vector<16x8xf32>
    %3 = tpu.matmul %0, %2, %cst {dimension_numbers = #tpu.dot_dimension_numbers<[1], [0], [0], [1], [0, 0, 1, 1], [], []>} : vector<16x8xf32>, vector<8x8xf32>, vector<16x8xf32> -> vector<16x8xf32>
    %c0_4 = arith.constant 0 : index
    %c0_5 = arith.constant 0 : index
    %4 = vector.load %arg4[%c0_4, %c0_5] : memref<8x16xf32, #tpu.memory_space<vmem>>, vector<8x16xf32>
    %cst_6 = arith.constant dense<0.000000e+00> : vector<16x16xf32>
    %5 = tpu.matmul %3, %4, %cst_6 {dimension_numbers = #tpu.dot_dimension_numbers<[1], [0], [0], [1], [0, 0, 1, 1], [], []>} : vector<16x8xf32>, vector<8x16xf32>, vector<16x16xf32> -> vector<16x16xf32>
    %c0_7 = arith.constant 0 : index
    %c0_8 = arith.constant 0 : index
    %c0_9 = arith.constant 0 : index
    %6 = vector.load %arg5[%c0_7, %c0_8, %c0_9] : memref<1x16x16xf32, #tpu.memory_space<vmem>>, vector<1x16x16xf32>
    %7 = vector.shape_cast %6 : vector<1x16x16xf32> to vector<16x16xf32>
    %8 = vector.shape_cast %5 : vector<16x16xf32> to vector<1x16x16xf32>
    tpu.vector_store %arg5[%c0_7, %c0_8, %c0_9], %8 {strides = array<i32>} : memref<1x16x16xf32, #tpu.memory_space<vmem>>, vector<1x16x16xf32>,
    return
  }
  func.func @transform_0(%arg0: i32, %arg1: i32) -> (i32, i32) {
    %c0_i32 = arith.constant 0 : i32
    %c0_i32_0 = arith.constant 0 : i32
    return %arg1, %c0_i32 : i32, i32
  }
  func.func @transform_1(%arg0: i32, %arg1: i32) -> (i32, i32, i32) {
    %c0_i32 = arith.constant 0 : i32
    %c0_i32_0 = arith.constant 0 : i32
    %c0_i32_1 = arith.constant 0 : i32
    return %arg0, %c0_i32, %c0_i32_0 : i32, i32, i32
  }
  func.func @transform_2(%arg0: i32, %arg1: i32) -> (i32, i32) {
    %c0_i32 = arith.constant 0 : i32
    %c0_i32_0 = arith.constant 0 : i32
    %c0_i32_1 = arith.constant 0 : i32
    return %c0_i32, %c0_i32_0 : i32, i32
  }
  func.func @transform_3(%arg0: i32, %arg1: i32) -> (i32, i32, i32) {
    %c0_i32 = arith.constant 0 : i32
    %c0_i32_0 = arith.constant 0 : i32
    return %arg0, %arg1, %c0_i32 : i32, i32, i32
  }
}

</mosaic_0001>

<bundles_post_ra>
// kernel: seg_detector_forward.2
= control target key start
LH: loop header
LB: loop body
LE: loop exit
PB: predicated region body
PF: predicated region fallthrough
CT: control target
= control target key end

     0   :  { %s464_s12 = smov 0   ;;  %s466_s13 = smov 0   ;;  %s503_s0 = inlined_call_operand.vmem [shape: f32[2,16,64], index: 0, kind: input, shape index: {}]   ;;  %s504_s1 = inlined_call_operand.vmem [shape: f32[6,16], index: 1, kind: input, shape index: {}]   ;;  %s505_s2 = inlined_call_operand.vmem [shape: f32[6,1], index: 2, kind: input, shape index: {}]   ;;  %s506_s3 = inlined_call_operand.vmem [shape: f32[2,6,64], index: 3, kind: output, shape index: {}]  }
   0x1   :  { %s468_s14 = smov 0  }
   0x2 LB: > { %s25_s15 = sadd.s32 1, %s434_s13  ;;  %p366_p0 = scmp.ge.s32.totalorder %s438_s14, 1  ;;  %s438_s14 = sphi %s468_s14, %s13_s14   ;;  %s434_s13 = sphi %s466_s13, %s508_s13   ;;  %s430_s12 = sphi %s464_s12, %s507_s12  }
   0x3   : > { %p27_p1 = scmp.ge.s32.totalorder %s25_s15, 2  ;;  %p156_p2 = scmp.lt.s32.totalorder %s438_s14, 3 }
   0x5   : > { %s510_s15 = smov (%p27_p1, %s25_s15), 0  ;;  %p157_p3 = pnand %p366_p0, %p156_p2 }
   0x6   : > { %p185_p4 = scmp.lt.s32.totalorder (!%p157_p3), %s430_s12, 1  ;;  %v440_v0 = vmov (!%p157_p3), 0.0|0.0   ;;  %vm441_vm0 = vmmov (!%p157_p3), 0   ;;  %v442_v1 = vmov (!%p157_p3), 0.0   ;;  %v203_v2 = vld [vmem:[%s505_s2] sm:$0x3f] (!%p157_p3) }
   0x7   : > { %160 = sbr.rel (%p157_p3) target bundleno = 238 (0xee), region = 32  ;;  %384 = vmatprep.subr.bf16.mxu0 (!%p157_p3), %v440_v0  ;;  %381 = vmatprep.mubr.msk.f32.mxu0 (!%p157_p3), %vm441_vm0, %v442_v1  ;;  %v443_v3 = vmov (!%p157_p3), 0   ;;  %v200_v7 = vld [vmem:[%s504_s1] sm:$0x3f] (!%p157_p3)  ;;  %vm209_vm1 = vcmask (!%p157_p3), 130048   ;;  %vm283_vm2 = vcmask (!%p157_p3), 521216  }
   0x8   : > { %415 = vset.pattern.permute.xlu0 (!%p157_p3), %v443_v3 }
   0x9   : > { %206 = vperm.xlu0 (!%p157_p3), %415, %v203_v2  }
   0xe   : > { %s512_s12 = smov (!%p185_p4, %s430_s12), 1 }
   0xf   : > { %s373_s18 = sshll.u32 %s512_s12, 4  ;;  %s369_s24 = sshll.u32 %s512_s12, 3 }
  0x10   : > { %s192_s21 = scalar_lea.vmem %s503_s0, %s373_s18  ;;  %s199_s27 = scalar_lea.vmem %s506_s3, %s369_s24 }
  0x11   : > { %v201_v4 = vld [vmem:[%s192_s21] sm:$0xff]  ;;  %v202_v5 = vld [vmem:[%s192_s21 + $0x8] sm:$0xff] }
  0x12   : > { %v385_v6 = vpack.c.bf16 %v202_v5, %v201_v4 }
  0x14   : > { %386 = vmatpush3.bf16.msra.mxu0 %v385_v6 }
  0x17   : > { %382 = vmatmul.mubr.msk.f32.vlgmr.msra.gmra.mrb[0].mxu0 %vm209_vm1, %v200_v7 }
  0x88   : > { %v207_v8 = vpop.permute.xlu0 %206 }
  0xea   : > { %v279_v9 = vpop.f32.mrb[0].mxu0 }
  0xeb   : > { %v280_v10 = vadd.f32 %v279_v9, %v207_v8  ;;  %v383_v11 = vpop.f32.mrb[1].mxu0 }
  0xed   : > { %284 = vst.msk [vmem:[%s199_s27] sm:$0x3f] %vm283_vm2, %v280_v10 }
  0xee PF: > { %s13_s14 = sadd.s32 1, %s438_s14   ;;  %s507_s12 = smov %s434_s13 }
  0xef   : > { %p10_p5 = scmp.ge.s32.totalorder %s13_s14, 4   ;;  %s508_s13 = smov %s510_s15 }
  0xf1   :  { %12 = sbr.rel (!%p10_p5) target bundleno = 2 (0x2), region = 62 }

// kernel: seg_detector_forward.3
= control target key start
LH: loop header
LB: loop body
LE: loop exit
PB: predicated region body
PF: predicated region fallthrough
CT: control target
= control target key end

     0   :  { %8 = vsyncpa [#allocation3], 0  ;;  %s799_s0 = inlined_call_operand.vmem [shape: f32[16,8], index: 0, kind: input, shape index: {}]   ;;  %s800_s1 = inlined_call_operand.vmem [shape: f32[12,8,8], index: 1, kind: input, shape index: {}]   ;;  %s801_s2 = inlined_call_operand.vmem [shape: f32[8,16], index: 2, kind: input, shape index: {}]   ;;  %s802_s3 = inlined_call_operand.hbm [shape: f32[12,16,16], index: 3, kind: output, shape index: {}]  }
   0x1   :  { %10 = vsyncpa [#allocation3 + $0x1], 0  ;;  %s671_s12 = smov 0   ;;  %s673_s13 = smov 0  }
   0x2   :  { %s675_s14 = smov 0   ;;  %s677_s15 = smov 0  }
   0x3   :  { %s679_s16 = smov 0   ;;  %s681_s17 = smov 0  }
   0x4 LB: > { %s477_s18 = sadd.s32 4294967295, %s646_s17   ;;  %s478_s19 = sadd.s32 4294967294, %s646_s17   ;;  %s646_s17 = sphi %s681_s17, %s16_s17   ;;  %s642_s16 = sphi %s679_s16, %s809_s16   ;;  %s638_s15 = sphi %s677_s15, %s808_s15   ;;  %s634_s14 = sphi %s675_s14, %s807_s14   ;;  %s630_s13 = sphi %s673_s13, %s806_s13   ;;  %s626_s12 = sphi %s671_s12, %s805_s12  }
   0x5   : > { %s28_s20 = sadd.s32 1, %s642_s16  ;;  %s110_s21 = sadd.s32 1, %s634_s14 }
   0x6   : > { %p30_p0 = scmp.ge.s32.totalorder %s28_s20, 12  ;;  %p120_p1 = scmp.ne.s32.totalorder %s634_s14, %s630_s13 }
   0x7   : > { %p121_p2 = scmp.eq.s32.totalorder %s477_s18, 11  ;;  %p126_p3 = scmp.ne.s32.totalorder %s630_s13, %s626_s12 }
   0x8   : > { %s811_s20 = smov (%p30_p0, %s28_s20), 0  ;;  %p127_p5 = scmp.eq.s32.totalorder %s478_s19, 11 }
   0x9   : > { %p711_p4 = por %p121_p2, %p120_p1  ;;  %s105_s23 = ssub.s32 %s642_s16, %s811_s20 }
   0xa   : > { %p482_p6 = scmp.ge.s32.totalorder %s646_s17, 1  ;;  %p108_p7 = scmp.eq.s32.totalorder %s105_s23, 0 }
   0xb   : > { %p718_p8 = por %p127_p5, %p126_p3  ;;  %p164_p9 = scmp.lt.s32.totalorder %s646_s17, 13 }
   0xc   : > { %s724_s25 = scalar_select %p108_p7, %s634_s14, %s110_s21  }
   0xd   : > { %p165_p10 = pnand %p482_p6, %p164_p9 }
   0xe   : > { %p198_p11 = scmp.lt.s32.totalorder (!%p165_p10), %s638_s15, 11  ;;  %v203_v0 = vld [vmem:[%s799_s0] sm:$0xff] (!%p165_p10)  ;;  %vm206_vm0 = vcmask (!%p165_p10), 64512   ;;  %v204_v2 = vld [vmem:[%s799_s0 + $0x8] sm:$0xff] (!%p165_p10)  ;;  %s189_s10 = sand.u32 (!%p165_p10), 1, %s630_s13   ;;  %vm370_vm1 = vcmask (!%p165_p10), 130048  }
   0xf   : > { %168 = sbr.rel (%p165_p10) target bundleno = 471 (0x1d7), region = 32  ;;  %503 = vmatprep.mubr.msk.f32.mxu0 (!%p165_p10), %vm206_vm0, %v203_v0  ;;  %v288_v3 = vld [vmem:[%s801_s2] sm:$0xff] (!%p165_p10)  ;;  %s483_s11 = sshll.u32 (!%p165_p10), %s189_s10, 4 }
  0x10   : > { %506 = vmatprep.subr.mxu1 (!%p165_p10), %v288_v3  ;;  %s191_s18 = scalar_lea.vmem (!%p165_p10), [#allocation2], %s483_s11  ;;  %s494_s21 = sshll.u32 (!%p165_p10), %s638_s15, 8 }
  0x11   : > { %507 = vmatpush3.msra.mxu1 (!%p165_p10), %v288_v3  ;;  %s389_s19 = sshll.u32 (!%p165_p10), %s191_s18, 4  ;;  %s751_s27 = scalar_lea.hbm (!%p165_p10), %s802_s3, %s494_s21  ;;  %s746_s19 = int_to_ptr.vmem [resolvable:$true] %s389_s19 }
  0x16   : > { %s199_s28 = scalar_select %p198_p11, %s638_s15, 11 }
  0x17   : > { %s648_s15 = smov [#allocation2]  }
  0x18   : > { %s484_s29 = sshll.u32 %s199_s28, 3  ;;  %s753_s28 = scalar_lea.sflag [#allocation3], %s189_s10 }
  0x19   : > { %s201_s5 = scalar_lea.vmem %s800_s1, %s484_s29  ;;  %s568_s29 = scalar_lea.vmem %s746_s19, 256 }
  0x1a   : > { %v205_v1 = vld [vmem:[%s201_s5] sm:$0xff]  ;;  %p569_p12 = scmp.ne.s32.totalorder %s746_s19, %s568_s29  ;;  %s572_s30 = sshll.u32 %s648_s15, 4  ;;  %s573_s30 = int_to_ptr.vmem [resolvable:$false] %s572_s30 }
  0x1b   : > { %501 = vmatprep.subr.mxu0 %v205_v1  ;;  %s574_s4 = scalar_lea.vmem %s573_s30, 512  ;;  %p575_p1 = scmp.lt.s32.totalorder %s746_s19, %s573_s30 }
  0x1c   : > { %502 = vmatpush3.msra.mxu0 %v205_v1  ;;  %p570_p13 = pnand %p569_p12, %p711_p4  ;;  %p576_p2 = scmp.lt.s32.totalorder %s574_s4, %s568_s29 }
  0x1d   : > { %504 = vmatmul.mubr.msk.f32.vlgmr.msra.gmra.mrb[0].mxu0 %vm206_vm0, %v204_v2 }
  0x1e   : > { %p571_p0 = pneg %p570_p13  ;;  %p577_p3 = por %p576_p2, %p575_p1 }
  0x20   : > { %p578_p5 = pnand %p577_p3, %p571_p0 }
  0xf0   : > { %v505_v4 = vpop.f32.mrb[0].mxu0 }
  0xf1   : > { %v279_v5 = vpop.f32.mrb[1].mxu0 }
  0xf2   : > { %508 = vmatprep.mubr.msk.f32.mxu1 %vm206_vm0, %v279_v5 }
  0xf3   : > { %509 = vmatmul.mubr.msk.f32.vlgmr.msra.gmra.mrb[0].mxu1 %vm206_vm0, %v505_v4 }
 0x1c6   : > { %v510_v6 = vpop.f32.mrb[0].mxu1 }
 0x1c7   : > { %372 = vst.msk [vmem:[%s191_s18 + $0x8] sm:$0xff] %vm370_vm1, %v510_v6  ;;  %v361_v7 = vpop.f32.mrb[1].mxu1 }
 0x1c8   : > { %371 = vst.msk [vmem:[%s191_s18] sm:$0xff] %vm370_vm1, %v361_v7 }
 0x1c9   : > { %581 = shalt.err (!%p578_p5)
}
 0x1ca   : > { %s582_s5 = scalar_lea.hbm %s751_s27, 256  ;;  %s586_s8 = scalar_lea.hbm %s802_s3, 3072 }
 0x1cb   : > { %p583_p6 = scmp.ne.s32.totalorder %s751_s27, %s582_s5  ;;  %p587_p10 = scmp.lt.u32.totalorder %s751_s27, %s802_s3 }
 0x1cc   : > { %p588_p11 = scmp.lt.u32.totalorder %s586_s8, %s582_s5  ;;  %p590_p13 = scmp.lt.u32.totalorder %s582_s5, %s751_s27 }
 0x1cd   : > { %p584_p7 = pnand %p583_p6, %p711_p4 }
 0x1ce   : > { %p589_p12 = por %p588_p11, %p587_p10 }
 0x1cf   : > { %p585_p9 = pneg %p584_p7 }
 0x1d0   : > { %p591_p0 = por %p590_p13, %p589_p12 }
 0x1d2   : > { %p592_p1 = pnand %p591_p0, %p585_p9 }
 0x1d4   : > { %595 = shalt.err (!%p592_p1)
}
 0x1d5   : > { %s649_s11 = smov 128   ;;  %s650_s18 = smov 8  }
 0x1d6   : > { %511 = dma.vmem_to_hbm [thread:$0]  (%p711_p4), %s746_s19, 256, %s751_s27, %s753_s28, %s649_s11, %s649_s11, %s650_s18  }
 0x1d7 PF: > { %p517_p2 = scmp.ge.s32.totalorder %s646_s17, 2  ;;  %s404_s21 = sand.u32 1, %s626_s12  }
 0x1d8   : > { %s405_s23 = scalar_lea.sflag [#allocation3], %s404_s21 }
 0x1d9   : > { %p514_p3 = pnand %p517_p2, %p718_p8 }
 0x1db   : > { %621 = dma.done.wait (!%p514_p3), %s405_s23, 256  }
 0x1dc   : > { %623 = vsyncadd (!%p514_p3), %s405_s23, 4294967040  ;;  %s16_s17 = sadd.s32 1, %s646_s17   ;;  %s805_s12 = smov %s630_s13 }
 0x1dd   : > { %p13_p5 = scmp.ge.s32.totalorder %s16_s17, 14   ;;  %s806_s13 = smov %s634_s14 }
 0x1de   : > { %s807_s14 = smov %s724_s25  ;;  %s808_s15 = smov %s642_s16 }
 0x1df   : > { %s809_s16 = smov %s811_s20  ;;  %15 = sbr.rel (!%p13_p5) target bundleno = 4 (0x4), region = 70 }
 0x1e6   :  { %410 = vsyncpa [#allocation3], 1 }
 0x1e7   :  { %412 = vsyncpa [#allocation3 + $0x1], 1 }

</bundles_post_ra>
